<compile_context>
chip_gen: v5e
topology: v5e:2x2
jax: 0.10.0
libtpu: 0.0.40
codegen_flags: <defaults>
</compile_context>

<pallas_src>
import math
import functools

import jax
import jax.numpy as jnp
from jax.experimental import pallas as pl
from jax.experimental.pallas import tpu as pltpu


# ----------------------------------------------------------------------------
# In-kernel helpers
# ----------------------------------------------------------------------------
def _dot(a, w):
    """a @ w with f32 accumulation; casts `a` to the weight dtype (bf16)."""
    return jnp.dot(a.astype(w.dtype), w, preferred_element_type=jnp.float32)


def _layernorm(x, g, b, eps=1e-5):
    """Biased-variance LayerNorm (matches PyTorch); statistics in f32."""
    mean = jnp.mean(x, axis=-1, keepdims=True)
    var = jnp.mean((x - mean) ** 2, axis=-1, keepdims=True)
    return (x - mean) * jax.lax.rsqrt(var + eps) * g + b


def _mha(q, k, v, wo, bo, ctx_ref, nhead):
    """Multi-head attention with a single fused output projection.

    q:(Sq,D) k,v:(Sk,D) f32, wo:(D,D) bf16, bo:(1,D) f32, ctx_ref: (Sq,D) f32
    VMEM scratch.  Per-head contexts are written into `ctx_ref` at their lane
    offset (the "concat" is free), then ONE (Sq,D)@(D,D) projection runs with
    full MXU contraction fill.  Softmax stays f32; its normalization uses the
    EUP approx reciprocal.
    """
    d = q.shape[-1]
    dh = d // nhead
    scale = 1.0 / math.sqrt(dh)
    for h in range(nhead):
        lo = h * dh
        qh = q[:, lo:lo + dh].astype(jnp.bfloat16)
        kh = k[:, lo:lo + dh].astype(jnp.bfloat16)
        vh = v[:, lo:lo + dh].astype(jnp.bfloat16)
        s = jax.lax.dot_general(qh, kh, (((1,), (1,)), ((), ())),
                                preferred_element_type=jnp.float32) * scale
        m = jnp.max(s, axis=-1, keepdims=True)
        p = jnp.exp(s - m)
        p = p * pl.reciprocal(jnp.sum(p, axis=-1, keepdims=True), approx=True)
        ctx_ref[:, lo:lo + dh] = jnp.dot(p.astype(jnp.bfloat16), vh,
                                         preferred_element_type=jnp.float32)
    return _dot(ctx_ref[...], wo) + bo


# ----------------------------------------------------------------------------
# Encoder kernel: one TransformerEncoderLayer per grid step along the L axis.
# Running activation persists in h_sc; pooled output written at the last layer.
# ----------------------------------------------------------------------------
def _encoder_kernel(h0_ref,
                    wqkv, bqkv, wo, bo, ln1_g, ln1_b,
                    w1, b1, w2, b2, ln2_g, ln2_b,
                    pooled_out,
                    h_sc, ctx_sc, *, nhead, d_model):
    l = pl.program_id(1)
    D = d_model

    @pl.when(l == 0)
    def _():
        h_sc[...] = h0_ref[0]          # input proj + pos-enc (computed in XLA)

    h = h_sc[...]
    qkv = _dot(h, wqkv[0]) + bqkv[0]                                 # fused QKV
    a = _mha(qkv[:, :D], qkv[:, D:2 * D], qkv[:, 2 * D:],
             wo[0], bo[0], ctx_sc, nhead)
    h = _layernorm(h + a, ln1_g[0], ln1_b[0])
    f = jnp.maximum(_dot(h, w1[0]) + b1[0], 0.0)                     # FF (relu)
    f = _dot(f, w2[0]) + b2[0]
    h = _layernorm(h + f, ln2_g[0], ln2_b[0])
    h_sc[...] = h

    @pl.when(l == pl.num_programs(1) - 1)
    def _():
        pooled_out[0] = jnp.mean(h, axis=0, keepdims=True)           # (1, D)


# ----------------------------------------------------------------------------
# Decoder kernel: one TransformerDecoderLayer per grid step along the L axis.
# Cross-attn K/V = precomputed batch-invariant (pe @ Wkv) + per-batch rank-1
# term (l2m(z) @ Wkv) + bias, all supplied as inputs.
# ----------------------------------------------------------------------------
def _decoder_kernel(tgt0_ref, kv_pe_ref, kv_z_ref,
                    sa_wqkv, sa_bqkv, sa_wo, sa_bo, ln1_g, ln1_b,
                    ca_wq, ca_bq, ca_bkv, ca_wo, ca_bo, ln2_g, ln2_b,
                    w1, b1, w2, b2, ln3_g, ln3_b,
                    h_out,
                    h_sc, ctx_sc, *, nhead, d_model):
    l = pl.program_id(1)
    D = d_model

    @pl.when(l == 0)
    def _():
        h_sc[...] = tgt0_ref[...]      # tgt_token + pos-enc (batch-invariant)

    h = h_sc[...]
    # self-attention
    qkv = _dot(h, sa_wqkv[0]) + sa_bqkv[0]
    a = _mha(qkv[:, :D], qkv[:, D:2 * D], qkv[:, 2 * D:],
             sa_wo[0], sa_bo[0], ctx_sc, nhead)
    h = _layernorm(h + a, ln1_g[0], ln1_b[0])
    # cross-attention (K/V precomputed: batch-invariant + rank-1 per-batch)
    q = _dot(h, ca_wq[0]) + ca_bq[0]
    kv = kv_pe_ref[0] + kv_z_ref[0, 0] + ca_bkv[0]                   # (S, 2D)
    c = _mha(q, kv[:, :D], kv[:, D:], ca_wo[0], ca_bo[0], ctx_sc, nhead)
    h = _layernorm(h + c, ln2_g[0], ln2_b[0])
    # feed-forward
    f = jnp.maximum(_dot(h, w1[0]) + b1[0], 0.0)
    f = _dot(f, w2[0]) + b2[0]
    h = _layernorm(h + f, ln3_g[0], ln3_b[0])
    h_sc[...] = h

    @pl.when(l == pl.num_programs(1) - 1)
    def _():
        h_out[0] = h                                                 # (S, D)


# ----------------------------------------------------------------------------
# pallas_call wrappers
# ----------------------------------------------------------------------------
def _per_layer_spec(arr):
    """Block = one layer's slice; streamed (double-buffered) along the L axis."""
    n = arr.ndim
    return pl.BlockSpec((1,) + arr.shape[1:],
                        lambda b, l, n=n: (l,) + (0,) * (n - 1))


_COMPILER_PARAMS = pltpu.CompilerParams(
    dimension_semantics=("parallel", "arbitrary"),   # batch // megacore, layers serial
    vmem_limit_bytes=64 * 1024 * 1024)


def encode(enc, x, pe, *, nhead, num_layers, d_model, latent_dim):
    B, S, _ = x.shape
    D = d_model
    # Stem hoisted to XLA (K=3 matmul is MXU-hostile): input proj + pos-enc.
    h0 = jnp.einsum('bsk,kd->bsd', x, enc['in_w']) + enc['in_b'] + pe   # (B,S,D)

    weights = [enc['wqkv'], enc['bqkv'], enc['wo'], enc['bo'],
               enc['ln1_g'], enc['ln1_b'],
               enc['w1'], enc['b1'], enc['w2'], enc['b2'],
               enc['ln2_g'], enc['ln2_b']]

    in_specs = ([pl.BlockSpec((1, S, D), lambda b, l: (b, 0, 0))]
                + [_per_layer_spec(w) for w in weights])

    pooled = pl.pallas_call(
        functools.partial(_encoder_kernel, nhead=nhead, d_model=D),
        grid=(B, num_layers),
        in_specs=in_specs,
        out_specs=pl.BlockSpec((1, 1, D), lambda b, l: (b, 0, 0)),
        out_shape=jax.ShapeDtypeStruct((B, 1, D), jnp.float32),
        scratch_shapes=[pltpu.VMEM((S, D), jnp.float32),   # running activation
                        pltpu.VMEM((S, D), jnp.float32)],  # attn head concat
        compiler_params=_COMPILER_PARAMS,
    )(h0, *weights)

    pooled = pooled[:, 0, :]                                         # (B, D)
    mu = pooled @ enc['mu_w'] + enc['mu_b']
    logvar = jnp.clip(pooled @ enc['lv_w'] + enc['lv_b'], -10.0, 10.0)
    return mu, logvar


def decode(dec, z, pe, *, nhead, num_layers, d_model, latent_dim):
    B = z.shape[0]
    S, D = pe.shape
    L = num_layers

    # XLA pre-pass: tiny / batch-invariant pieces hoisted out of the kernel.
    tgt0 = dec['tgt_token'] + pe                                     # (S, D)
    mem_z = z @ dec['l2m_w'] + dec['l2m_b']                          # (B, D)
    ca_wkv_f32 = dec['ca_wkv'].astype(jnp.float32)                   # (L, D, 2D)
    kv_pe = jnp.einsum('sd,lde->lse', pe, ca_wkv_f32)                # (L, S, 2D)
    kv_z = jnp.einsum('bd,lde->ble', mem_z, ca_wkv_f32)              # (B, L, 2D)
    kv_z = kv_z[:, :, None, :]                                       # (B, L, 1, 2D)

    weights = [dec['sa_wqkv'], dec['sa_bqkv'], dec['sa_wo'], dec['sa_bo'],
               dec['ln1_g'], dec['ln1_b'],
               dec['ca_wq'], dec['ca_bq'], dec['ca_bkv'],
               dec['ca_wo'], dec['ca_bo'],
               dec['ln2_g'], dec['ln2_b'],
               dec['w1'], dec['b1'], dec['w2'], dec['b2'],
               dec['ln3_g'], dec['ln3_b']]

    in_specs = ([pl.BlockSpec((S, D), lambda b, l: (0, 0)),               # tgt0
                 pl.BlockSpec((1, S, 2 * D), lambda b, l: (l, 0, 0)),     # kv_pe
                 pl.BlockSpec((1, 1, 1, 2 * D), lambda b, l: (b, l, 0, 0))]  # kv_z
                + [_per_layer_spec(w) for w in weights])

    h_final = pl.pallas_call(
        functools.partial(_decoder_kernel, nhead=nhead, d_model=D),
        grid=(B, L),
        in_specs=in_specs,
        out_specs=pl.BlockSpec((1, S, D), lambda b, l: (b, 0, 0)),
        out_shape=jax.ShapeDtypeStruct((B, S, D), jnp.float32),
        scratch_shapes=[pltpu.VMEM((S, D), jnp.float32),
                        pltpu.VMEM((S, D), jnp.float32)],
        compiler_params=_COMPILER_PARAMS,
    )(tgt0, kv_pe, kv_z, *weights)

    # Output projection (N=3) hoisted to XLA -> kernel output stays lane-dense.
    recon = jnp.einsum('bsd,dk->bsk', h_final, dec['out_w']) + dec['out_b']
    return recon


# ----------------------------------------------------------------------------
# Glue (positional encoding buffer, reparameterization) + full forward
# ----------------------------------------------------------------------------
def positional_encoding(seq_len, d_model):
    position = jnp.arange(seq_len, dtype=jnp.float32)[:, None]
    div_term = jnp.exp(-math.log(10000.0)
                       * jnp.arange(0, d_model, 2, dtype=jnp.float32) / d_model)
    pe = jnp.zeros((seq_len, d_model), jnp.float32)
    pe = pe.at[:, 0::2].set(jnp.sin(position * div_term))
    pe = pe.at[:, 1::2].set(jnp.cos(position * div_term))
    return pe


def rna3d_vae_forward(params, x, eps_key, *, d_model, nhead, num_layers,
                      latent_dim):
    B, S, _ = x.shape
    pe = positional_encoding(S, d_model)
    mu, logvar = encode(params['enc'], x, pe, nhead=nhead,
                        num_layers=num_layers, d_model=d_model,
                        latent_dim=latent_dim)
    eps = jax.random.normal(eps_key, mu.shape, dtype=jnp.float32)
    z = mu + eps * jnp.exp(0.5 * logvar)          # reparameterize (host-side RNG)
    recon = decode(params['dec'], z, pe, nhead=nhead, num_layers=num_layers,
                   d_model=d_model, latent_dim=latent_dim)
    return recon, mu, logvar


# ----------------------------------------------------------------------------
# Deterministic parameter initialization.  Per-layer weights carry a leading L
# axis (streamed per grid step).  Q/K/V packed as (D, 3D) columns [Q|K|V]
# (torch's in_proj_weight transposed).  All in-kernel matmul weights are bf16;
# biases / LayerNorm params / tiny wrapper-side weights stay f32.  Per-layer
# 1-D params are stored (L, 1, X) so their per-layer blocks are (1, 1, X).
# ----------------------------------------------------------------------------
def init_params(key, d_model, num_layers, latent_dim, nhead):
    D, L = d_model, num_layers
    dff_e, dff_d = 4 * D, 1 * D
    scale = 0.02
    keys = iter(jax.random.split(key, 32))
    bf16 = jnp.bfloat16

    def w(shape, dtype=jnp.float32):
        return (scale * jax.random.normal(next(keys), shape)).astype(dtype)

    def zeros_(shape):
        return jnp.zeros(shape, jnp.float32)

    def ones_(shape):
        return jnp.ones(shape, jnp.float32)

    enc = {
        'in_w': w((3, D)), 'in_b': zeros_((D,)),
        'wqkv': w((L, D, 3 * D), bf16), 'bqkv': zeros_((L, 1, 3 * D)),
        'wo': w((L, D, D), bf16), 'bo': zeros_((L, 1, D)),
        'ln1_g': ones_((L, 1, D)), 'ln1_b': zeros_((L, 1, D)),
        'w1': w((L, D, dff_e), bf16), 'b1': zeros_((L, 1, dff_e)),
        'w2': w((L, dff_e, D), bf16), 'b2': zeros_((L, 1, D)),
        'ln2_g': ones_((L, 1, D)), 'ln2_b': zeros_((L, 1, D)),
        'mu_w': w((D, latent_dim)), 'mu_b': zeros_((latent_dim,)),
        'lv_w': w((D, latent_dim)), 'lv_b': zeros_((latent_dim,)),
    }
    dec = {
        'tgt_token': zeros_((1, D)),      # nn.Parameter(torch.zeros(1, 1, D))
        'l2m_w': w((latent_dim, D)), 'l2m_b': zeros_((D,)),
        'sa_wqkv': w((L, D, 3 * D), bf16), 'sa_bqkv': zeros_((L, 1, 3 * D)),
        'sa_wo': w((L, D, D), bf16), 'sa_bo': zeros_((L, 1, D)),
        'ln1_g': ones_((L, 1, D)), 'ln1_b': zeros_((L, 1, D)),
        'ca_wq': w((L, D, D), bf16), 'ca_bq': zeros_((L, 1, D)),
        'ca_wkv': w((L, D, 2 * D), bf16), 'ca_bkv': zeros_((L, 1, 2 * D)),
        'ca_wo': w((L, D, D), bf16), 'ca_bo': zeros_((L, 1, D)),
        'ln2_g': ones_((L, 1, D)), 'ln2_b': zeros_((L, 1, D)),
        'w1': w((L, D, dff_d), bf16), 'b1': zeros_((L, 1, dff_d)),
        'w2': w((L, dff_d, D), bf16), 'b2': zeros_((L, 1, D)),
        'ln3_g': ones_((L, 1, D)), 'ln3_b': zeros_((L, 1, D)),
        'out_w': w((D, 3)), 'out_b': zeros_((3,)),
    }
    return {'enc': enc, 'dec': dec}


# ----------------------------------------------------------------------------
if __name__ == "__main__":
    B, S = 2, 8                 # batch, sequence length
    d_model, num_layers, latent_dim, nhead = 32, 2, 8, 4

    key = jax.random.PRNGKey(0)
    kx, kp, ke = jax.random.split(key, 3)

    x = jax.random.normal(kx, (B, S, 3), dtype=jnp.float32)    # (B, seq, xyz)
    params = init_params(kp, d_model, num_layers, latent_dim, nhead)

    recon, mu, logvar = rna3d_vae_forward(
        params, x, ke, d_model=d_model, nhead=nhead,
        num_layers=num_layers, latent_dim=latent_dim)
    jax.block_until_ready((recon, mu, logvar))

    assert recon.shape == (B, S, 3)
    assert mu.shape == (B, latent_dim)
    assert logvar.shape == (B, latent_dim)
    assert bool(jnp.all(jnp.isfinite(recon)))
    assert bool(jnp.all(jnp.isfinite(mu)))
    assert bool(jnp.all(jnp.isfinite(logvar)))
    print("KERNEL_OK")
</pallas_src>

<mosaic_0001>
module attributes {stable_mosaic.version = 11 : i64} {
  func.func @_encoder_kernel(%arg0: i32, %arg1: i32, %arg2: memref<1x8x32xf32, #tpu.memory_space<vmem>>, %arg3: memref<1x32x96xbf16, #tpu.memory_space<vmem>>, %arg4: memref<1x1x96xf32, #tpu.memory_space<vmem>>, %arg5: memref<1x32x32xbf16, #tpu.memory_space<vmem>>, %arg6: memref<1x1x32xf32, #tpu.memory_space<vmem>>, %arg7: memref<1x1x32xf32, #tpu.memory_space<vmem>>, %arg8: memref<1x1x32xf32, #tpu.memory_space<vmem>>, %arg9: memref<1x32x128xbf16, #tpu.memory_space<vmem>>, %arg10: memref<1x1x128xf32, #tpu.memory_space<vmem>>, %arg11: memref<1x128x32xbf16, #tpu.memory_space<vmem>>, %arg12: memref<1x1x32xf32, #tpu.memory_space<vmem>>, %arg13: memref<1x1x32xf32, #tpu.memory_space<vmem>>, %arg14: memref<1x1x32xf32, #tpu.memory_space<vmem>>, %arg15: memref<1x1x32xf32, #tpu.memory_space<vmem>>, %arg16: memref<8x32xf32, #tpu.memory_space<vmem>>, %arg17: memref<8x32xf32, #tpu.memory_space<vmem>>) attributes {dimension_semantics = [#tpu.dimension_semantics<parallel>, #tpu.dimension_semantics<arbitrary>], iteration_bounds = array<i64: 2, 2>, scalar_prefetch = 0 : i64, scratch_operands = 2 : i64, tpu.core_type = #tpu.core_type<tc>, window_params = [{transform_indices = @transform_0, window_bounds = array<i64: 1, 8, 32>}, {transform_indices = @transform_1, window_bounds = array<i64: 1, 32, 96>}, {transform_indices = @transform_2, window_bounds = array<i64: 1, 1, 96>}, {transform_indices = @transform_3, window_bounds = array<i64: 1, 32, 32>}, {transform_indices = @transform_4, window_bounds = array<i64: 1, 1, 32>}, {transform_indices = @transform_5, window_bounds = array<i64: 1, 1, 32>}, {transform_indices = @transform_6, window_bounds = array<i64: 1, 1, 32>}, {transform_indices = @transform_7, window_bounds = array<i64: 1, 32, 128>}, {transform_indices = @transform_8, window_bounds = array<i64: 1, 1, 128>}, {transform_indices = @transform_9, window_bounds = array<i64: 1, 128, 32>}, {transform_indices = @transform_10, window_bounds = array<i64: 1, 1, 32>}, {transform_indices = @transform_11, window_bounds = array<i64: 1, 1, 32>}, {transform_indices = @transform_12, window_bounds = array<i64: 1, 1, 32>}, {transform_indices = @transform_13, window_bounds = array<i64: 1, 1, 32>}]} {
    %c0_i32 = arith.constant 0 : i32
    %0 = arith.cmpi eq, %arg1, %c0_i32 : i32
    %1 = arith.extui %0 : i1 to i32
    %c0_i32_0 = arith.constant 0 : i32
    %2 = arith.cmpi ne, %1, %c0_i32_0 : i32
    scf.if %2 {
      %c0_82 = arith.constant 0 : index
      %c0_83 = arith.constant 0 : index
      %c0_84 = arith.constant 0 : index
      %188 = vector.load %arg2[%c0_82, %c0_83, %c0_84] : memref<1x8x32xf32, #tpu.memory_space<vmem>>, vector<1x8x32xf32>
      %189 = vector.shape_cast %188 : vector<1x8x32xf32> to vector<8x32xf32>
      %c0_85 = arith.constant 0 : index
      %c0_86 = arith.constant 0 : index
      %190 = vector.load %arg16[%c0_85, %c0_86] : memref<8x32xf32, #tpu.memory_space<vmem>>, vector<8x32xf32>
      tpu.vector_store %arg16[%c0_85, %c0_86], %189 {strides = array<i32>} : memref<8x32xf32, #tpu.memory_space<vmem>>, vector<8x32xf32>,
    } else {
    }
    %c0 = arith.constant 0 : index
    %c0_1 = arith.constant 0 : index
    %3 = vector.load %arg16[%c0, %c0_1] : memref<8x32xf32, #tpu.memory_space<vmem>>, vector<8x32xf32>
    %c0_2 = arith.constant 0 : index
    %c0_3 = arith.constant 0 : index
    %c0_4 = arith.constant 0 : index
    %4 = vector.load %arg3[%c0_2, %c0_3, %c0_4] : memref<1x32x96xbf16, #tpu.memory_space<vmem>>, vector<1x32x96xbf16>
    %5 = vector.shape_cast %4 : vector<1x32x96xbf16> to vector<32x96xbf16>
    %6 = arith.truncf %3 : vector<8x32xf32> to vector<8x32xbf16>
    %cst = arith.constant dense<0.000000e+00> : vector<8x96xf32>
    %7 = tpu.matmul %6, %5, %cst {dimension_numbers = #tpu.dot_dimension_numbers<[1], [0], [0], [1], [0, 0, 1, 1], [], []>} : vector<8x32xbf16>, vector<32x96xbf16>, vector<8x96xf32> -> vector<8x96xf32>
    %c0_5 = arith.constant 0 : index
    %c0_6 = arith.constant 0 : index
    %c0_7 = arith.constant 0 : index
    %8 = vector.load %arg4[%c0_5, %c0_6, %c0_7] : memref<1x1x96xf32, #tpu.memory_space<vmem>>, vector<1x1x96xf32>
    %9 = vector.shape_cast %8 : vector<1x1x96xf32> to vector<1x96xf32>
    %10 = vector.broadcast %9 : vector<1x96xf32> to vector<8x96xf32>
    %11 = arith.addf %7, %10 : vector<8x96xf32>
    %12 = vector.extract_strided_slice %11 {offsets = [0, 0], sizes = [8, 32], strides = [1, 1]} : vector<8x96xf32> to vector<8x32xf32>
    %13 = vector.extract_strided_slice %11 {offsets = [0, 32], sizes = [8, 32], strides = [1, 1]} : vector<8x96xf32> to vector<8x32xf32>
    %14 = vector.extract_strided_slice %11 {offsets = [0, 64], sizes = [8, 32], strides = [1, 1]} : vector<8x96xf32> to vector<8x32xf32>
    %c0_8 = arith.constant 0 : index
    %c0_9 = arith.constant 0 : index
    %c0_10 = arith.constant 0 : index
    %15 = vector.load %arg5[%c0_8, %c0_9, %c0_10] : memref<1x32x32xbf16, #tpu.memory_space<vmem>>, vector<1x32x32xbf16>
    %16 = vector.shape_cast %15 : vector<1x32x32xbf16> to vector<32x32xbf16>
    %c0_11 = arith.constant 0 : index
    %c0_12 = arith.constant 0 : index
    %c0_13 = arith.constant 0 : index
    %17 = vector.load %arg6[%c0_11, %c0_12, %c0_13] : memref<1x1x32xf32, #tpu.memory_space<vmem>>, vector<1x1x32xf32>
    %18 = vector.shape_cast %17 : vector<1x1x32xf32> to vector<1x32xf32>
    %19 = vector.extract_strided_slice %12 {offsets = [0, 0], sizes = [8, 8], strides = [1, 1]} : vector<8x32xf32> to vector<8x8xf32>
    %20 = arith.truncf %19 : vector<8x8xf32> to vector<8x8xbf16>
    %21 = vector.extract_strided_slice %13 {offsets = [0, 0], sizes = [8, 8], strides = [1, 1]} : vector<8x32xf32> to vector<8x8xf32>
    %22 = arith.truncf %21 : vector<8x8xf32> to vector<8x8xbf16>
    %23 = vector.extract_strided_slice %14 {offsets = [0, 0], sizes = [8, 8], strides = [1, 1]} : vector<8x32xf32> to vector<8x8xf32>
    %24 = arith.truncf %23 : vector<8x8xf32> to vector<8x8xbf16>
    %cst_14 = arith.constant dense<0.000000e+00> : vector<8x8xf32>
    %25 = tpu.matmul %20, %22, %cst_14 {dimension_numbers = #tpu.dot_dimension_numbers<[1], [1], [0], [0], [0, 0, 1, 0], [], []>} : vector<8x8xbf16>, vector<8x8xbf16>, vector<8x8xf32> -> vector<8x8xf32>
    %cst_15 = arith.constant 0.353553385 : f32
    %26 = vector.broadcast %cst_15 : f32 to vector<8x8xf32>
    %27 = arith.mulf %25, %26 : vector<8x8xf32>
    %cst_16 = arith.constant dense<0xFF800000> : vector<8xf32>
    %28 = vector.multi_reduction <maximumf>, %27, %cst_16 [1] : vector<8x8xf32> to vector<8xf32>
    %29 = vector.shape_cast %28 : vector<8xf32> to vector<8x1xf32>
    %30 = vector.broadcast %29 : vector<8x1xf32> to vector<8x8xf32>
    %31 = arith.subf %27, %30 : vector<8x8xf32>
    %32 = math.exp %31 : vector<8x8xf32>
    %cst_17 = arith.constant dense<0.000000e+00> : vector<8xf32>
    %33 = vector.multi_reduction <add>, %32, %cst_17 [1] : vector<8x8xf32> to vector<8xf32>
    %34 = vector.shape_cast %33 : vector<8xf32> to vector<8x1xf32>
    %35 = tpu.reciprocal %34 {approx = true} : vector<8x1xf32> -> vector<8x1xf32>
    %36 = vector.broadcast %35 : vector<8x1xf32> to vector<8x8xf32>
    %37 = arith.mulf %32, %36 : vector<8x8xf32>
    %38 = arith.truncf %37 : vector<8x8xf32> to vector<8x8xbf16>
    %cst_18 = arith.constant dense<0.000000e+00> : vector<8x8xf32>
    %39 = tpu.matmul %38, %24, %cst_18 {dimension_numbers = #tpu.dot_dimension_numbers<[1], [0], [0], [1], [0, 0, 1, 1], [], []>} : vector<8x8xbf16>, vector<8x8xbf16>, vector<8x8xf32> -> vector<8x8xf32>
    %c0_19 = arith.constant 0 : index
    %c0_20 = arith.constant 0 : index
    %40 = vector.load %arg17[%c0_19, %c0_20] : memref<8x32xf32, #tpu.memory_space<vmem>>, vector<8x8xf32>
    tpu.vector_store %arg17[%c0_19, %c0_20], %39 {strides = array<i32>} : memref<8x32xf32, #tpu.memory_space<vmem>>, vector<8x8xf32>,
    %41 = vector.extract_strided_slice %12 {offsets = [0, 8], sizes = [8, 8], strides = [1, 1]} : vector<8x32xf32> to vector<8x8xf32>
    %42 = arith.truncf %41 : vector<8x8xf32> to vector<8x8xbf16>
    %43 = vector.extract_strided_slice %13 {offsets = [0, 8], sizes = [8, 8], strides = [1, 1]} : vector<8x32xf32> to vector<8x8xf32>
    %44 = arith.truncf %43 : vector<8x8xf32> to vector<8x8xbf16>
    %45 = vector.extract_strided_slice %14 {offsets = [0, 8], sizes = [8, 8], strides = [1, 1]} : vector<8x32xf32> to vector<8x8xf32>
    %46 = arith.truncf %45 : vector<8x8xf32> to vector<8x8xbf16>
    %cst_21 = arith.constant dense<0.000000e+00> : vector<8x8xf32>
    %47 = tpu.matmul %42, %44, %cst_21 {dimension_numbers = #tpu.dot_dimension_numbers<[1], [1], [0], [0], [0, 0, 1, 0], [], []>} : vector<8x8xbf16>, vector<8x8xbf16>, vector<8x8xf32> -> vector<8x8xf32>
    %cst_22 = arith.constant 0.353553385 : f32
    %48 = vector.broadcast %cst_22 : f32 to vector<8x8xf32>
    %49 = arith.mulf %47, %48 : vector<8x8xf32>
    %cst_23 = arith.constant dense<0xFF800000> : vector<8xf32>
    %50 = vector.multi_reduction <maximumf>, %49, %cst_23 [1] : vector<8x8xf32> to vector<8xf32>
    %51 = vector.shape_cast %50 : vector<8xf32> to vector<8x1xf32>
    %52 = vector.broadcast %51 : vector<8x1xf32> to vector<8x8xf32>
    %53 = arith.subf %49, %52 : vector<8x8xf32>
    %54 = math.exp %53 : vector<8x8xf32>
    %cst_24 = arith.constant dense<0.000000e+00> : vector<8xf32>
    %55 = vector.multi_reduction <add>, %54, %cst_24 [1] : vector<8x8xf32> to vector<8xf32>
    %56 = vector.shape_cast %55 : vector<8xf32> to vector<8x1xf32>
    %57 = tpu.reciprocal %56 {approx = true} : vector<8x1xf32> -> vector<8x1xf32>
    %58 = vector.broadcast %57 : vector<8x1xf32> to vector<8x8xf32>
    %59 = arith.mulf %54, %58 : vector<8x8xf32>
    %60 = arith.truncf %59 : vector<8x8xf32> to vector<8x8xbf16>
    %cst_25 = arith.constant dense<0.000000e+00> : vector<8x8xf32>
    %61 = tpu.matmul %60, %46, %cst_25 {dimension_numbers = #tpu.dot_dimension_numbers<[1], [0], [0], [1], [0, 0, 1, 1], [], []>} : vector<8x8xbf16>, vector<8x8xbf16>, vector<8x8xf32> -> vector<8x8xf32>
    %c0_26 = arith.constant 0 : index
    %c8 = arith.constant 8 : index
    %62 = vector.load %arg17[%c0_26, %c8] : memref<8x32xf32, #tpu.memory_space<vmem>>, vector<8x8xf32>
    tpu.vector_store %arg17[%c0_26, %c8], %61 {strides = array<i32>} : memref<8x32xf32, #tpu.memory_space<vmem>>, vector<8x8xf32>,
    %63 = vector.extract_strided_slice %12 {offsets = [0, 16], sizes = [8, 8], strides = [1, 1]} : vector<8x32xf32> to vector<8x8xf32>
    %64 = arith.truncf %63 : vector<8x8xf32> to vector<8x8xbf16>
    %65 = vector.extract_strided_slice %13 {offsets = [0, 16], sizes = [8, 8], strides = [1, 1]} : vector<8x32xf32> to vector<8x8xf32>
    %66 = arith.truncf %65 : vector<8x8xf32> to vector<8x8xbf16>
    %67 = vector.extract_strided_slice %14 {offsets = [0, 16], sizes = [8, 8], strides = [1, 1]} : vector<8x32xf32> to vector<8x8xf32>
    %68 = arith.truncf %67 : vector<8x8xf32> to vector<8x8xbf16>
    %cst_27 = arith.constant dense<0.000000e+00> : vector<8x8xf32>
    %69 = tpu.matmul %64, %66, %cst_27 {dimension_numbers = #tpu.dot_dimension_numbers<[1], [1], [0], [0], [0, 0, 1, 0], [], []>} : vector<8x8xbf16>, vector<8x8xbf16>, vector<8x8xf32> -> vector<8x8xf32>
    %cst_28 = arith.constant 0.353553385 : f32
    %70 = vector.broadcast %cst_28 : f32 to vector<8x8xf32>
    %71 = arith.mulf %69, %70 : vector<8x8xf32>
    %cst_29 = arith.constant dense<0xFF800000> : vector<8xf32>
    %72 = vector.multi_reduction <maximumf>, %71, %cst_29 [1] : vector<8x8xf32> to vector<8xf32>
    %73 = vector.shape_cast %72 : vector<8xf32> to vector<8x1xf32>
    %74 = vector.broadcast %73 : vector<8x1xf32> to vector<8x8xf32>
    %75 = arith.subf %71, %74 : vector<8x8xf32>
    %76 = math.exp %75 : vector<8x8xf32>
    %cst_30 = arith.constant dense<0.000000e+00> : vector<8xf32>
    %77 = vector.multi_reduction <add>, %76, %cst_30 [1] : vector<8x8xf32> to vector<8xf32>
    %78 = vector.shape_cast %77 : vector<8xf32> to vector<8x1xf32>
    %79 = tpu.reciprocal %78 {approx = true} : vector<8x1xf32> -> vector<8x1xf32>
    %80 = vector.broadcast %79 : vector<8x1xf32> to vector<8x8xf32>
    %81 = arith.mulf %76, %80 : vector<8x8xf32>
    %82 = arith.truncf %81 : vector<8x8xf32> to vector<8x8xbf16>
    %cst_31 = arith.constant dense<0.000000e+00> : vector<8x8xf32>
    %83 = tpu.matmul %82, %68, %cst_31 {dimension_numbers = #tpu.dot_dimension_numbers<[1], [0], [0], [1], [0, 0, 1, 1], [], []>} : vector<8x8xbf16>, vector<8x8xbf16>, vector<8x8xf32> -> vector<8x8xf32>
    %c0_32 = arith.constant 0 : index
    %c16 = arith.constant 16 : index
    %84 = vector.load %arg17[%c0_32, %c16] : memref<8x32xf32, #tpu.memory_space<vmem>>, vector<8x8xf32>
    tpu.vector_store %arg17[%c0_32, %c16], %83 {strides = array<i32>} : memref<8x32xf32, #tpu.memory_space<vmem>>, vector<8x8xf32>,
    %85 = vector.extract_strided_slice %12 {offsets = [0, 24], sizes = [8, 8], strides = [1, 1]} : vector<8x32xf32> to vector<8x8xf32>
    %86 = arith.truncf %85 : vector<8x8xf32> to vector<8x8xbf16>
    %87 = vector.extract_strided_slice %13 {offsets = [0, 24], sizes = [8, 8], strides = [1, 1]} : vector<8x32xf32> to vector<8x8xf32>
    %88 = arith.truncf %87 : vector<8x8xf32> to vector<8x8xbf16>
    %89 = vector.extract_strided_slice %14 {offsets = [0, 24], sizes = [8, 8], strides = [1, 1]} : vector<8x32xf32> to vector<8x8xf32>
    %90 = arith.truncf %89 : vector<8x8xf32> to vector<8x8xbf16>
    %cst_33 = arith.constant dense<0.000000e+00> : vector<8x8xf32>
    %91 = tpu.matmul %86, %88, %cst_33 {dimension_numbers = #tpu.dot_dimension_numbers<[1], [1], [0], [0], [0, 0, 1, 0], [], []>} : vector<8x8xbf16>, vector<8x8xbf16>, vector<8x8xf32> -> vector<8x8xf32>
    %cst_34 = arith.constant 0.353553385 : f32
    %92 = vector.broadcast %cst_34 : f32 to vector<8x8xf32>
    %93 = arith.mulf %91, %92 : vector<8x8xf32>
    %cst_35 = arith.constant dense<0xFF800000> : vector<8xf32>
    %94 = vector.multi_reduction <maximumf>, %93, %cst_35 [1] : vector<8x8xf32> to vector<8xf32>
    %95 = vector.shape_cast %94 : vector<8xf32> to vector<8x1xf32>
    %96 = vector.broadcast %95 : vector<8x1xf32> to vector<8x8xf32>
    %97 = arith.subf %93, %96 : vector<8x8xf32>
    %98 = math.exp %97 : vector<8x8xf32>
    %cst_36 = arith.constant dense<0.000000e+00> : vector<8xf32>
    %99 = vector.multi_reduction <add>, %98, %cst_36 [1] : vector<8x8xf32> to vector<8xf32>
    %100 = vector.shape_cast %99 : vector<8xf32> to vector<8x1xf32>
    %101 = tpu.reciprocal %100 {approx = true} : vector<8x1xf32> -> vector<8x1xf32>
    %102 = vector.broadcast %101 : vector<8x1xf32> to vector<8x8xf32>
    %103 = arith.mulf %98, %102 : vector<8x8xf32>
    %104 = arith.truncf %103 : vector<8x8xf32> to vector<8x8xbf16>
    %cst_37 = arith.constant dense<0.000000e+00> : vector<8x8xf32>
    %105 = tpu.matmul %104, %90, %cst_37 {dimension_numbers = #tpu.dot_dimension_numbers<[1], [0], [0], [1], [0, 0, 1, 1], [], []>} : vector<8x8xbf16>, vector<8x8xbf16>, vector<8x8xf32> -> vector<8x8xf32>
    %c0_38 = arith.constant 0 : index
    %c24 = arith.constant 24 : index
    %106 = vector.load %arg17[%c0_38, %c24] : memref<8x32xf32, #tpu.memory_space<vmem>>, vector<8x8xf32>
    tpu.vector_store %arg17[%c0_38, %c24], %105 {strides = array<i32>} : memref<8x32xf32, #tpu.memory_space<vmem>>, vector<8x8xf32>,
    %c0_39 = arith.constant 0 : index
    %c0_40 = arith.constant 0 : index
    %107 = vector.load %arg17[%c0_39, %c0_40] : memref<8x32xf32, #tpu.memory_space<vmem>>, vector<8x32xf32>
    %108 = arith.truncf %107 : vector<8x32xf32> to vector<8x32xbf16>
    %cst_41 = arith.constant dense<0.000000e+00> : vector<8x32xf32>
    %109 = tpu.matmul %108, %16, %cst_41 {dimension_numbers = #tpu.dot_dimension_numbers<[1], [0], [0], [1], [0, 0, 1, 1], [], []>} : vector<8x32xbf16>, vector<32x32xbf16>, vector<8x32xf32> -> vector<8x32xf32>
    %110 = vector.broadcast %18 : vector<1x32xf32> to vector<8x32xf32>
    %111 = arith.addf %109, %110 : vector<8x32xf32>
    %112 = arith.addf %3, %111 : vector<8x32xf32>
    %c0_42 = arith.constant 0 : index
    %c0_43 = arith.constant 0 : index
    %c0_44 = arith.constant 0 : index
    %113 = vector.load %arg7[%c0_42, %c0_43, %c0_44] : memref<1x1x32xf32, #tpu.memory_space<vmem>>, vector<1x1x32xf32>
    %114 = vector.shape_cast %113 : vector<1x1x32xf32> to vector<1x32xf32>
    %c0_45 = arith.constant 0 : index
    %c0_46 = arith.constant 0 : index
    %c0_47 = arith.constant 0 : index
    %115 = vector.load %arg8[%c0_45, %c0_46, %c0_47] : memref<1x1x32xf32, #tpu.memory_space<vmem>>, vector<1x1x32xf32>
    %116 = vector.shape_cast %115 : vector<1x1x32xf32> to vector<1x32xf32>
    %cst_48 = arith.constant dense<0.000000e+00> : vector<8xf32>
    %117 = vector.multi_reduction <add>, %112, %cst_48 [1] : vector<8x32xf32> to vector<8xf32>
    %118 = vector.shape_cast %117 : vector<8xf32> to vector<8x1xf32>
    %cst_49 = arith.constant 3.200000e+01 : f32
    %119 = vector.broadcast %cst_49 : f32 to vector<8x1xf32>
    %120 = arith.divf %118, %119 : vector<8x1xf32>
    %121 = vector.broadcast %120 : vector<8x1xf32> to vector<8x32xf32>
    %122 = arith.subf %112, %121 : vector<8x32xf32>
    %123 = arith.mulf %122, %122 : vector<8x32xf32>
    %cst_50 = arith.constant dense<0.000000e+00> : vector<8xf32>
    %124 = vector.multi_reduction <add>, %123, %cst_50 [1] : vector<8x32xf32> to vector<8xf32>
    %125 = vector.shape_cast %124 : vector<8xf32> to vector<8x1xf32>
    %cst_51 = arith.constant 3.200000e+01 : f32
    %126 = vector.broadcast %cst_51 : f32 to vector<8x1xf32>
    %127 = arith.divf %125, %126 : vector<8x1xf32>
    %128 = vector.broadcast %120 : vector<8x1xf32> to vector<8x32xf32>
    %129 = arith.subf %112, %128 : vector<8x32xf32>
    %cst_52 = arith.constant 9.99999974E-6 : f32
    %130 = vector.broadcast %cst_52 : f32 to vector<8x1xf32>
    %131 = arith.addf %127, %130 : vector<8x1xf32>
    %132 = math.rsqrt %131 : vector<8x1xf32>
    %133 = vector.broadcast %132 : vector<8x1xf32> to vector<8x32xf32>
    %134 = arith.mulf %129, %133 : vector<8x32xf32>
    %135 = vector.broadcast %114 : vector<1x32xf32> to vector<8x32xf32>
    %136 = arith.mulf %134, %135 : vector<8x32xf32>
    %137 = vector.broadcast %116 : vector<1x32xf32> to vector<8x32xf32>
    %138 = arith.addf %136, %137 : vector<8x32xf32>
    %c0_53 = arith.constant 0 : index
    %c0_54 = arith.constant 0 : index
    %c0_55 = arith.constant 0 : index
    %139 = vector.load %arg9[%c0_53, %c0_54, %c0_55] : memref<1x32x128xbf16, #tpu.memory_space<vmem>>, vector<1x32x128xbf16>
    %140 = vector.shape_cast %139 : vector<1x32x128xbf16> to vector<32x128xbf16>
    %141 = arith.truncf %138 : vector<8x32xf32> to vector<8x32xbf16>
    %cst_56 = arith.constant dense<0.000000e+00> : vector<8x128xf32>
    %142 = tpu.matmul %141, %140, %cst_56 {dimension_numbers = #tpu.dot_dimension_numbers<[1], [0], [0], [1], [0, 0, 1, 1], [], []>} : vector<8x32xbf16>, vector<32x128xbf16>, vector<8x128xf32> -> vector<8x128xf32>
    %c0_57 = arith.constant 0 : index
    %c0_58 = arith.constant 0 : index
    %c0_59 = arith.constant 0 : index
    %143 = vector.load %arg10[%c0_57, %c0_58, %c0_59] : memref<1x1x128xf32, #tpu.memory_space<vmem>>, vector<1x1x128xf32>
    %144 = vector.shape_cast %143 : vector<1x1x128xf32> to vector<1x128xf32>
    %145 = vector.broadcast %144 : vector<1x128xf32> to vector<8x128xf32>
    %146 = arith.addf %142, %145 : vector<8x128xf32>
    %cst_60 = arith.constant 0.000000e+00 : f32
    %147 = vector.broadcast %cst_60 : f32 to vector<8x128xf32>
    %148 = arith.maximumf %146, %147 : vector<8x128xf32>
    %c0_61 = arith.constant 0 : index
    %c0_62 = arith.constant 0 : index
    %c0_63 = arith.constant 0 : index
    %149 = vector.load %arg11[%c0_61, %c0_62, %c0_63] : memref<1x128x32xbf16, #tpu.memory_space<vmem>>, vector<1x128x32xbf16>
    %150 = vector.shape_cast %149 : vector<1x128x32xbf16> to vector<128x32xbf16>
    %151 = arith.truncf %148 : vector<8x128xf32> to vector<8x128xbf16>
    %cst_64 = arith.constant dense<0.000000e+00> : vector<8x32xf32>
    %152 = tpu.matmul %151, %150, %cst_64 {dimension_numbers = #tpu.dot_dimension_numbers<[1], [0], [0], [1], [0, 0, 1, 1], [], []>} : vector<8x128xbf16>, vector<128x32xbf16>, vector<8x32xf32> -> vector<8x32xf32>
    %c0_65 = arith.constant 0 : index
    %c0_66 = arith.constant 0 : index
    %c0_67 = arith.constant 0 : index
    %153 = vector.load %arg12[%c0_65, %c0_66, %c0_67] : memref<1x1x32xf32, #tpu.memory_space<vmem>>, vector<1x1x32xf32>
    %154 = vector.shape_cast %153 : vector<1x1x32xf32> to vector<1x32xf32>
    %155 = vector.broadcast %154 : vector<1x32xf32> to vector<8x32xf32>
    %156 = arith.addf %152, %155 : vector<8x32xf32>
    %157 = arith.addf %138, %156 : vector<8x32xf32>
    %c0_68 = arith.constant 0 : index
    %c0_69 = arith.constant 0 : index
    %c0_70 = arith.constant 0 : index
    %158 = vector.load %arg13[%c0_68, %c0_69, %c0_70] : memref<1x1x32xf32, #tpu.memory_space<vmem>>, vector<1x1x32xf32>
    %159 = vector.shape_cast %158 : vector<1x1x32xf32> to vector<1x32xf32>
    %c0_71 = arith.constant 0 : index
    %c0_72 = arith.constant 0 : index
    %c0_73 = arith.constant 0 : index
    %160 = vector.load %arg14[%c0_71, %c0_72, %c0_73] : memref<1x1x32xf32, #tpu.memory_space<vmem>>, vector<1x1x32xf32>
    %161 = vector.shape_cast %160 : vector<1x1x32xf32> to vector<1x32xf32>
    %cst_74 = arith.constant dense<0.000000e+00> : vector<8xf32>
    %162 = vector.multi_reduction <add>, %157, %cst_74 [1] : vector<8x32xf32> to vector<8xf32>
    %163 = vector.shape_cast %162 : vector<8xf32> to vector<8x1xf32>
    %cst_75 = arith.constant 3.200000e+01 : f32
    %164 = vector.broadcast %cst_75 : f32 to vector<8x1xf32>
    %165 = arith.divf %163, %164 : vector<8x1xf32>
    %166 = vector.broadcast %165 : vector<8x1xf32> to vector<8x32xf32>
    %167 = arith.subf %157, %166 : vector<8x32xf32>
    %168 = arith.mulf %167, %167 : vector<8x32xf32>
    %cst_76 = arith.constant dense<0.000000e+00> : vector<8xf32>
    %169 = vector.multi_reduction <add>, %168, %cst_76 [1] : vector<8x32xf32> to vector<8xf32>
    %170 = vector.shape_cast %169 : vector<8xf32> to vector<8x1xf32>
    %cst_77 = arith.constant 3.200000e+01 : f32
    %171 = vector.broadcast %cst_77 : f32 to vector<8x1xf32>
    %172 = arith.divf %170, %171 : vector<8x1xf32>
    %173 = vector.broadcast %165 : vector<8x1xf32> to vector<8x32xf32>
    %174 = arith.subf %157, %173 : vector<8x32xf32>
    %cst_78 = arith.constant 9.99999974E-6 : f32
    %175 = vector.broadcast %cst_78 : f32 to vector<8x1xf32>
    %176 = arith.addf %172, %175 : vector<8x1xf32>
    %177 = math.rsqrt %176 : vector<8x1xf32>
    %178 = vector.broadcast %177 : vector<8x1xf32> to vector<8x32xf32>
    %179 = arith.mulf %174, %178 : vector<8x32xf32>
    %180 = vector.broadcast %159 : vector<1x32xf32> to vector<8x32xf32>
    %181 = arith.mulf %179, %180 : vector<8x32xf32>
    %182 = vector.broadcast %161 : vector<1x32xf32> to vector<8x32xf32>
    %183 = arith.addf %181, %182 : vector<8x32xf32>
    %c0_79 = arith.constant 0 : index
    %c0_80 = arith.constant 0 : index
    %184 = vector.load %arg16[%c0_79, %c0_80] : memref<8x32xf32, #tpu.memory_space<vmem>>, vector<8x32xf32>
    tpu.vector_store %arg16[%c0_79, %c0_80], %183 {strides = array<i32>} : memref<8x32xf32, #tpu.memory_space<vmem>>, vector<8x32xf32>,
    %c1_i32 = arith.constant 1 : i32
    %185 = arith.cmpi eq, %arg1, %c1_i32 : i32
    %186 = arith.extui %185 : i1 to i32
    %c0_i32_81 = arith.constant 0 : i32
    %187 = arith.cmpi ne, %186, %c0_i32_81 : i32
    scf.if %187 {
      %cst_82 = arith.constant dense<0.000000e+00> : vector<32xf32>
      %188 = vector.multi_reduction <add>, %183, %cst_82 [0] : vector<8x32xf32> to vector<32xf32>
      %189 = vector.shape_cast %188 : vector<32xf32> to vector<1x32xf32>
      %cst_83 = arith.constant 8.000000e+00 : f32
      %190 = vector.broadcast %cst_83 : f32 to vector<1x32xf32>
      %191 = arith.divf %189, %190 : vector<1x32xf32>
      %c0_84 = arith.constant 0 : index
      %c0_85 = arith.constant 0 : index
      %c0_86 = arith.constant 0 : index
      %192 = vector.load %arg15[%c0_84, %c0_85, %c0_86] : memref<1x1x32xf32, #tpu.memory_space<vmem>>, vector<1x1x32xf32>
      %193 = vector.shape_cast %192 : vector<1x1x32xf32> to vector<1x32xf32>
      %194 = vector.shape_cast %191 : vector<1x32xf32> to vector<1x1x32xf32>
      tpu.vector_store %arg15[%c0_84, %c0_85, %c0_86], %194 {strides = array<i32>} : memref<1x1x32xf32, #tpu.memory_space<vmem>>, vector<1x1x32xf32>,
    } else {
    }
    return
  }
  func.func @transform_0(%arg0: i32, %arg1: i32) -> (i32, i32, i32) {
    %c0_i32 = arith.constant 0 : i32
    %c0_i32_0 = arith.constant 0 : i32
    %c0_i32_1 = arith.constant 0 : i32
    return %arg0, %c0_i32, %c0_i32_0 : i32, i32, i32
  }
  func.func @transform_1(%arg0: i32, %arg1: i32) -> (i32, i32, i32) {
    %c0_i32 = arith.constant 0 : i32
    %c0_i32_0 = arith.constant 0 : i32
    %c0_i32_1 = arith.constant 0 : i32
    return %arg1, %c0_i32, %c0_i32_0 : i32, i32, i32
  }
  func.func @transform_2(%arg0: i32, %arg1: i32) -> (i32, i32, i32) {
    %c0_i32 = arith.constant 0 : i32
    %c0_i32_0 = arith.constant 0 : i32
    %c0_i32_1 = arith.constant 0 : i32
    return %arg1, %c0_i32, %c0_i32_0 : i32, i32, i32
  }
  func.func @transform_3(%arg0: i32, %arg1: i32) -> (i32, i32, i32) {
    %c0_i32 = arith.constant 0 : i32
    %c0_i32_0 = arith.constant 0 : i32
    %c0_i32_1 = arith.constant 0 : i32
    return %arg1, %c0_i32, %c0_i32_0 : i32, i32, i32
  }
  func.func @transform_4(%arg0: i32, %arg1: i32) -> (i32, i32, i32) {
    %c0_i32 = arith.constant 0 : i32
    %c0_i32_0 = arith.constant 0 : i32
    %c0_i32_1 = arith.constant 0 : i32
    return %arg1, %c0_i32, %c0_i32_0 : i32, i32, i32
  }
  func.func @transform_5(%arg0: i32, %arg1: i32) -> (i32, i32, i32) {
    %c0_i32 = arith.constant 0 : i32
    %c0_i32_0 = arith.constant 0 : i32
    %c0_i32_1 = arith.constant 0 : i32
    return %arg1, %c0_i32, %c0_i32_0 : i32, i32, i32
  }
  func.func @transform_6(%arg0: i32, %arg1: i32) -> (i32, i32, i32) {
    %c0_i32 = arith.constant 0 : i32
    %c0_i32_0 = arith.constant 0 : i32
    %c0_i32_1 = arith.constant 0 : i32
    return %arg1, %c0_i32, %c0_i32_0 : i32, i32, i32
  }
  func.func @transform_7(%arg0: i32, %arg1: i32) -> (i32, i32, i32) {
    %c0_i32 = arith.constant 0 : i32
    %c0_i32_0 = arith.constant 0 : i32
    %c0_i32_1 = arith.constant 0 : i32
    return %arg1, %c0_i32, %c0_i32_0 : i32, i32, i32
  }
  func.func @transform_8(%arg0: i32, %arg1: i32) -> (i32, i32, i32) {
    %c0_i32 = arith.constant 0 : i32
    %c0_i32_0 = arith.constant 0 : i32
    %c0_i32_1 = arith.constant 0 : i32
    return %arg1, %c0_i32, %c0_i32_0 : i32, i32, i32
  }
  func.func @transform_9(%arg0: i32, %arg1: i32) -> (i32, i32, i32) {
    %c0_i32 = arith.constant 0 : i32
    %c0_i32_0 = arith.constant 0 : i32
    %c0_i32_1 = arith.constant 0 : i32
    return %arg1, %c0_i32, %c0_i32_0 : i32, i32, i32
  }
  func.func @transform_10(%arg0: i32, %arg1: i32) -> (i32, i32, i32) {
    %c0_i32 = arith.constant 0 : i32
    %c0_i32_0 = arith.constant 0 : i32
    %c0_i32_1 = arith.constant 0 : i32
    return %arg1, %c0_i32, %c0_i32_0 : i32, i32, i32
  }
  func.func @transform_11(%arg0: i32, %arg1: i32) -> (i32, i32, i32) {
    %c0_i32 = arith.constant 0 : i32
    %c0_i32_0 = arith.constant 0 : i32
    %c0_i32_1 = arith.constant 0 : i32
    return %arg1, %c0_i32, %c0_i32_0 : i32, i32, i32
  }
  func.func @transform_12(%arg0: i32, %arg1: i32) -> (i32, i32, i32) {
    %c0_i32 = arith.constant 0 : i32
    %c0_i32_0 = arith.constant 0 : i32
    %c0_i32_1 = arith.constant 0 : i32
    return %arg1, %c0_i32, %c0_i32_0 : i32, i32, i32
  }
  func.func @transform_13(%arg0: i32, %arg1: i32) -> (i32, i32, i32) {
    %c0_i32 = arith.constant 0 : i32
    %c0_i32_0 = arith.constant 0 : i32
    %c0_i32_1 = arith.constant 0 : i32
    return %arg0, %c0_i32, %c0_i32_0 : i32, i32, i32
  }
}

</mosaic_0001>

<bundles_post_ra>
// kernel: tpu_custom_call.1
= control target key start
LH: loop header
LB: loop body
LE: loop exit
PB: predicated region body
PF: predicated region fallthrough
CT: control target
= control target key end

     0   :  { %s2080_s0 = inlined_call_operand.vmem [shape: f32[2,8,32], index: 0, kind: input, shape index: {}]   ;;  %s2081_s1 = inlined_call_operand.vmem [shape: bf16[2,32,96], index: 1, kind: input, shape index: {}]   ;;  %s2082_s2 = inlined_call_operand.vmem [shape: f32[2,1,96], index: 2, kind: input, shape index: {}]   ;;  %s2083_s3 = inlined_call_operand.vmem [shape: bf16[2,32,32], index: 3, kind: input, shape index: {}]   ;;  %s2084_s4 = inlined_call_operand.vmem [shape: f32[2,1,32], index: 4, kind: input, shape index: {}]   ;;  %s2085_s5 = inlined_call_operand.vmem [shape: f32[2,1,32], index: 5, kind: input, shape index: {}]   ;;  %s2086_s6 = inlined_call_operand.vmem [shape: f32[2,1,32], index: 6, kind: input, shape index: {}]   ;;  %s2087_s7 = inlined_call_operand.vmem [shape: bf16[2,32,128], index: 7, kind: input, shape index: {}]   ;;  %s2088_s8 = inlined_call_operand.vmem [shape: f32[2,1,128], index: 8, kind: input, shape index: {}]   ;;  %s2089_s9 = inlined_call_operand.vmem [shape: bf16[2,128,32], index: 9, kind: input, shape index: {}]   ;;  %s2090_s10 = inlined_call_operand.vmem [shape: f32[2,1,32], index: 10, kind: input, shape index: {}]   ;;  %s2091_s11 = inlined_call_operand.vmem [shape: f32[2,1,32], index: 11, kind: input, shape index: {}]   ;;  %s2092_s12 = inlined_call_operand.vmem [shape: f32[2,1,32], index: 12, kind: input, shape index: {}]   ;;  %s2093_s13 = inlined_call_operand.hbm [shape: f32[2,1,32], index: 13, kind: output, shape index: {}]  }
   0x1   :  { %2107 = sst [smem:[#allocation19_spill]] %s2080_s0 }
   0x2   :  { %2108 = sst [smem:[#allocation20_spill]] %s2081_s1 }
   0x3   :  { %2109 = sst [smem:[#allocation21_spill]] %s2082_s2 }
   0x4   :  { %2110 = sst [smem:[#allocation22_spill]] %s2083_s3 }
   0x5   :  { %2111 = sst [smem:[#allocation23_spill]] %s2087_s7 }
   0x6   :  { %2112 = sst [smem:[#allocation24_spill]] %s2092_s12 }
   0x7   :  { %2113 = sst [smem:[#allocation25_spill]] %s2093_s13 }
   0x8   :  { %18 = vsyncpa [#allocation5], 0 }
   0x9   :  { %20 = vsyncpa [#allocation5 + $0x1], 0  ;;  %s1791_s25 = smov 0   ;;  %s1793_s26 = smov 0  }
   0xa   :  { %s1795_s27 = smov 0   ;;  %s1797_s28 = smov 0  }
   0xb   :  { %s1799_s29 = smov 0   ;;  %s1801_s30 = smov 0  }
   0xc   :  { %s1803_s14 = smov 0   ;;  %s1805_s15 = smov 0  }
   0xd LB: > { %2114 = sst [smem:[#allocation7_spill]] %s1675_s25  ;;  %s1387_s16 = sadd.s32 4294967295, %s1703_s15   ;;  %s1703_s15 = sphi %s1805_s15, %s26_s15   ;;  %s1699_s14 = sphi %s1803_s14, %s2154_s14   ;;  %s1695_s30 = sphi %s1801_s30, %s2153_s30   ;;  %s1691_s29 = sphi %s1799_s29, %s2152_s29   ;;  %s1687_s28 = sphi %s1797_s28, %s2151_s28   ;;  %s1683_s27 = sphi %s1795_s27, %s2150_s27   ;;  %s1679_s26 = sphi %s1793_s26, %s2156_s26   ;;  %s1675_s25 = sphi %s1791_s25, %s2155_s25  }
   0xe   : > { %2115 = sst [smem:[#allocation8_spill]] %s1683_s27  ;;  %s1388_s17 = sadd.s32 4294967294, %s1703_s15  }
   0xf   : > { %2116 = sst [smem:[#allocation9_spill]] %s1687_s28  ;;  %s35_s18 = sadd.s32 1, %s1695_s30 }
  0x10   : > { %2117 = sst [smem:[#allocation10_spill]] %s1691_s29  ;;  %p36_p0 = scmp.ge.s32.totalorder %s35_s18, 2 }
  0x11   : > { %2118 = sst [smem:[#allocation11_spill]] %s1695_s30  ;;  %s38_s19 = sadd.s32 1, %s1699_s14 }
  0x12   : > { %2119 = sst [smem:[#allocation12_spill]] %s1699_s14  ;;  %p393_p1 = scmp.ne.s32.totalorder %s1683_s27, %s1679_s26 }
  0x13   : > { %2120 = sst [smem:[#allocation13_spill]] %s1703_s15  ;;  %p394_p2 = scmp.eq.s32.totalorder %s1387_s16, 3 }
  0x14   : > { %s2158_s18 = smov (%p36_p0, %s35_s18), 0  ;;  %s2160_s19 = smov (!%p36_p0, %s38_s19), %s1699_s14 }
  0x15   : > { %2121 = sst [smem:[#allocation14_spill]] %s2158_s18  ;;  %p1840_p3 = por %p394_p2, %p393_p1 }
  0x16   : > { %p399_p4 = scmp.ne.s32.totalorder %s1679_s26, %s1675_s25  ;;  %p40_p5 = scmp.ge.s32.totalorder %s2160_s19, 2 }
  0x17   : > { %s2122_s20 = scalar_select %p1840_p3, 1, 0 }
  0x18   : > { %p400_p6 = scmp.eq.s32.totalorder %s1388_s17, 3  ;;  %p1391_p7 = scmp.ge.s32.totalorder %s1703_s15, 1 }
  0x19   : > { %2123 = sst [smem:[#allocation15_spill]] %s2122_s20  ;;  %p505_p8 = scmp.lt.s32.totalorder %s1703_s15, 5 }
  0x1a   : > { %s2162_s19 = smov (%p40_p5, %s2160_s19), 0  ;;  %p1850_p9 = por %p400_p6, %p399_p4 }
  0x1b   : > { %2124 = sst [smem:[#allocation16_spill]] %s2162_s19  ;;  %p506_p10 = pnand %p1391_p7, %p505_p8 }
  0x1c   : > { %s2125_s21 = scalar_select %p1850_p9, 1, 0 }
  0x1d   : > { %s380_s22 = ssub.s32 %s1699_s14, %s2162_s19  ;;  %s383_s23 = sadd.s32 1, %s1683_s27 }
  0x1e   : > { %2126 = sst [smem:[#allocation17_spill]] %s2125_s21  ;;  %p381_p11 = scmp.eq.s32.totalorder %s380_s22, 0 }
  0x1f   : > { %509 = sbr.rel (%p506_p10) target bundleno = 2379 (0x94b), region = 72  ;;  %p591_p12 = scmp.lt.s32.totalorder (!%p506_p10), %s1691_s29, 1 }
  0x20   : > { %s1858_s24 = scalar_select %p381_p11, %s1683_s27, %s383_s23  }
  0x21   : > { %p595_p13 = scmp.lt.s32.totalorder (!%p506_p10), %s1687_s28, 1  ;;  %s2128_s0 = sld [smem:[#allocation19_spill]] (!%p506_p10) }
  0x22   : > { %2127 = sst [smem:[#allocation18_spill]] %s1858_s24  ;;  %s2134_s13 = sand.u32 (!%p506_p10), 1, %s1679_s26  }
  0x23   : > { %s2129_s1 = sld [smem:[#allocation20_spill]] (!%p506_p10)  ;;  %s1924_s20 = scalar_lea.vmem (!%p506_p10), [#allocation4], %s2134_s13 }
  0x24   : > { %s592_s17 = scalar_select %p591_p12, %s1691_s29, 1 }
  0x25   : > { %s1865_s18 = scalar_select %p595_p13, %s1687_s28, 1 }
  0x26   : > { %s1392_s22 = sshll.u32 %s592_s17, 3  ;;  %s2130_s2 = sld [smem:[#allocation21_spill]] }
  0x27   : > { %s594_s16 = scalar_lea.vmem %s2128_s0, %s1392_s22  ;;  %s1472_s14 = sshll.u32 %s1865_s18, 4 }
  0x28   : > { %s2131_s3 = sld [smem:[#allocation22_spill]]  ;;  %s632_s19 = scalar_lea.vmem %s2090_s10, %s1865_s18 }
  0x29   : > { %s599_s27 = scalar_lea.vmem %s2129_s1, %s1472_s14  ;;  %s2132_s7 = sld [smem:[#allocation23_spill]] }
  0x2a   : > { %s635_s1 = scalar_lea.vmem %s2091_s11, %s1865_s18  ;;  %s2133_s24 = sld [smem:[#allocation24_spill]] }
  0x2c   : > { %s602_s15 = scalar_lea.vmem %s2130_s2, %s1865_s18  ;;  %s2135_s2 = sld [smem:[#allocation9_spill]] }
  0x2e   : > { %s1881_s29 = scalar_lea.vmem %s2131_s3, %s1472_s14  ;;  %s1475_s3 = sshll.u32 %s1865_s18, 6 }
  0x2f   : > { %s1898_s21 = scalar_lea.vmem %s2132_s7, %s1472_s14  ;;  %s1912_s0 = scalar_lea.vmem %s2089_s9, %s1475_s3 }
  0x30   : > { %s638_s7 = scalar_lea.vmem %s2133_s24, %s1865_s18 }
  0x32   : > { %p1401_p0 = scmp.ne.s32.totalorder %s2135_s2, 0 }
  0x34   : > { %643 = sbr.rel (%p1401_p0) target bundleno = 59 (0x3b), region = 76 }
  0x39   : > { %v644_v0 = vld [vmem:[%s594_s16] sm:$0xff]  ;;  %vm645_vm0 = vcmask 261120  }
  0x3a   : > { %646 = vst.msk [vmem:[#allocation2] sm:$0xff] %vm645_vm0, %v644_v0 }
  0x3b PF: > { %v1477_v1 = vld [vmem:[%s599_s27 + $0x8] sm:$0xff]  ;;  %v1476_v2 = vld [vmem:[%s599_s27] sm:$0xff]  ;;  %vm669_vm1 = vcmask 261120   ;;  %s1705_s2 = smov 88   ;;  %s1706_s3 = smov 96   ;;  %vm695_vm2 = vcmask 64512  }
  0x3c   : > { %679 = vmatpush.bf16.msra.mxu0 %v1477_v1  ;;  %v1577_v5 = vld [vmem:[%s602_s15] ss:$0 sm:$0xff]  ;;  %s1707_s27 = smov 120   ;;  %s1708_s16 = smov 72   ;;  %vm733_vm3 = vcmask 1043456   ;;  %vm812_vm4 = vcmask 130112  }
  0x3d   : > { %s1709_s24 = smov 104   ;;  %s1710_s15 = smov 80   ;;  %vm875_vm5 = vcmask 195712   ;;  %vm938_vm6 = vcmask 261312  }
  0x3e   : > { %s1711_s28 = smov 64   ;;  %s1712_s17 = smov 112  }
  0x3f   : > { %s1713_s23 = smov 56   ;;  %s1714_s22 = smov 48  }
  0x40   : > { %680 = vmatpush.bf16.msra.mxu0 %v1476_v2  ;;  %s1715_s12 = smov 40   ;;  %s1716_s30 = smov 16  }
  0x41   : > { %v1927_v3 = vld [vmem:[#allocation2] sm:$0xff]  ;;  %s1717_s14 = smov 8   ;;  %s1718_s25 = smov 24  }
  0x42   : > { %v652_v4 = vpack.c.bf16 %v1927_v3, %v1927_v3  ;;  %s2141_s13 = sld [smem:[#allocation9_spill]] }
  0x44   : > { %1410 = vmatmul.msk.bf16.vlgmr.msra.gmra.mxu0 %vm669_vm1, %v652_v4 }
  0x48   : > { %p1469_p1 = scmp.ne.s32.totalorder %s2141_s13, 1 }
  0xc1   : > { %v682_v6 = vpop.f32.mrf.mxu0 }
  0xc2   : > { %v683_v7 = vadd.f32 %v1577_v5, %v682_v6 }
  0xc4   : > { %v1932_v8 = vpack.c.bf16 %v683_v7, %v683_v7 }
  0xc6   : > { %753 = vrot.lane.b32.xlu2 %v1932_v8, %s1705_s2  ;;  %693 = vrot.lane.b32.xlu0 %v1932_v8, %s1706_s3  ;;  %s2136_s3 = scalar_lea.vmem %s2084_s4, %s1865_s18 }
  0xc9   : > { %v684_v9 = vpop.f32.mrf.mxu0 }
  0xce   : > { %751 = vrot.lane.b32.xlu2 %v1932_v8, %s1707_s27  ;;  %s2137_s27 = scalar_lea.vmem %s2085_s5, %s1865_s18 }
  0xd6   : > { %879 = vrot.lane.b32.xlu2 %v1932_v8, %s1708_s16 }
  0xde   : > { %877 = vrot.lane.b32.xlu2 %v1932_v8, %s1709_s24 }
  0xe6   : > { %816 = vrot.lane.b32.xlu2 %v1932_v8, %s1710_s15  ;;  %s2138_s15 = scalar_lea.vmem %s2086_s6, %s1865_s18 }
 0x120   : > { %v754_v10 = vpop.permute.xlu2 %753 }
 0x121   : > { %v759_v37 = vsel %vm695_vm2, %v754_v10, 0 }
 0x128   : > { %v752_v11 = vpop.permute.xlu2 %751 }
 0x130   : > { %v880_v12 = vpop.permute.xlu2 %879 }
 0x131   : > { %v885_v13 = vsel %vm695_vm2, %v880_v12, 0 }
 0x132   : > { %894 = vmatpush.bf16.xpose.msra.mxu3 %v885_v13 }
 0x138   : > { %v878_v14 = vpop.permute.xlu2 %877  ;;  %v694_v15 = vpop.permute.xlu0 %693 }
 0x139   : > { %1417 = vmatmul.msk.bf16.vlgmr.msra.gmra.mxu3 %vm695_vm2, %v878_v14  ;;  %v700_v16 = vsel %vm695_vm2, %v694_v15, 0 }
 0x13a   : > { %709 = vmatpush.bf16.xpose.msra.mxu1 %v700_v16 }
 0x140   : > { %v817_v17 = vpop.permute.xlu2 %816 }
 0x141   : > { %1411 = vmatmul.msk.bf16.vlgmr.msra.gmra.mxu1 %vm695_vm2, %v1932_v8  ;;  %v822_v18 = vsel %vm695_vm2, %v817_v17, 0 }
 0x142   : > { %831 = vmatpush.bf16.xpose.msrb.mxu0 %v822_v18 }
 0x1bc   : > { %v896_v19 = vpop.f32.mrf.mxu3 }
 0x1bd   : > { %v900_v30 = vmul.f32 0.35355338, %v896_v19 }
 0x1be   : > { %v711_v20 = vpop.f32.mrf.mxu1 }
 0x1bf   : > { %v715_v21 = vmul.f32 0.35355338, %v711_v20  ;;  %v901_v31 = vsel %vm695_vm2, %v900_v30, -inf }
 0x1c1   : > { %v716_v22 = vsel %vm695_vm2, %v715_v21, -inf }
 0x1c2   : > { %717 = vmax.xlane.f32.xlu0 %v716_v22 }
 0x1c4   : > { %v898_v23 = vpop.f32.mrf.mxu3 }
 0x1c6   : > { %v713_v24 = vpop.f32.mrf.mxu1 }
 0x235   : > { %v718_v25 = vpop.xlane.xlu0 %717 }
 0x236   : > { %v719_v26 = vsub.f32 %v715_v21, %v718_v25 }
 0x238   : > { %v720_v27 = vmul.f32 1.442695, %v719_v26  ;;  %v1479_v26 = vld [vmem:[%s1881_s29 + $0x8] sm:$0xff] }
 0x239   : > { %966 = vmatpush.bf16.msra.mxu0 %v1479_v26 }
 0x23a   : > { %1585 = vpow2.f32 %v720_v27  ;;  %v1478_v27 = vld [vmem:[%s1881_s29] sm:$0xff] }
 0x23d   : > { %967 = vmatpush.bf16.msra.mxu0 %v1478_v27 }
 0x240   : > { %v1586_v28 = vpop.eup %1585 }
 0x241   : > { %v722_v29 = vsel %vm695_vm2, %v1586_v28, 0.0 }
 0x242   : > { %723 = vadd.xlane.f32.xlu1 %v722_v29 }
 0x25b   : > { %728 = vrot.lane.b32.xlu1 %v1932_v8, %s1711_s28 }
 0x263   : > { %814 = vrot.lane.b32.xlu1 %v1932_v8, %s1712_s17 }
 0x28d   : > { %902 = vmax.xlane.f32.xlu1 %v901_v31 }
 0x2b5   : > { %v724_v32 = vpop.xlane.xlu1 %723 }
 0x2b6   : > { %1587 = vrcp.f32 %v724_v32 }
 0x2bc   : > { %v1588_v33 = vpop.eup %1587 }
 0x2bd   : > { %v726_v34 = vmul.f32 %v1588_v33, %v1586_v28  ;;  %v1578_v33 = vld [vmem:[%s2136_s3] ss:$0 sm:$0xff] }
 0x2bf   : > { %v727_v38 = vpack.c.bf16 %v726_v34, %v726_v34 }
 0x2cd   : > { %v729_v35 = vpop.permute.xlu1 %728 }
 0x2ce   : > { %v735_v36 = vsel %vm733_vm3, %v729_v35, 0 }
 0x2cf   : > { %744 = vmatpush.bf16.msra.mxu2 %v735_v36 }
 0x2d2   : > { %1412 = vmatmul.msk.bf16.vlgmr.msra.gmra.mxu2 %vm695_vm2, %v727_v38 }
 0x2d3   : > { %768 = vmatpush.bf16.xpose.msrb.mxu2 %v759_v37 }
 0x2d5   : > { %v815_v39 = vpop.permute.xlu1 %814 }
 0x2d6   : > { %1415 = vmatmul.msk.bf16.vlgmr.msrb.gmra.mxu0 %vm695_vm2, %v815_v39  ;;  %v1719_v39 = vmov 32.0  }
 0x2e2   : > { %1413 = vmatmul.msk.bf16.vlgmr.msrb.gmra.mxu2 %vm695_vm2, %v752_v11 }
 0x300   : > { %v903_v45 = vpop.xlane.xlu1 %902 }
 0x301   : > { %v904_v47 = vsub.f32 %v900_v30, %v903_v45 }
 0x303   : > { %v905_v48 = vmul.f32 1.442695, %v904_v47 }
 0x305   : > { %1589 = vpow2.f32 %v905_v48 }
 0x30b   : > { %v1590_v52 = vpop.eup %1589 }
 0x30c   : > { %v907_v54 = vsel %vm695_vm2, %v1590_v52, 0.0 }
 0x353   : > { %v833_v40 = vpop.f32.mrf.mxu0 }
 0x354   : > { %v837_v41 = vmul.f32 0.35355338, %v833_v40 }
 0x355   : > { %v746_v42 = vpop.f32.mrf.mxu2 }
 0x356   : > { %750 = vst.msk [vmem:[#allocation3] sm:$0xff] %vm695_vm2, %v746_v42  ;;  %v838_v43 = vsel %vm695_vm2, %v837_v41, -inf }
 0x357   : > { %839 = vmax.xlane.f32.xlu0 %v838_v43 }
 0x35b   : > { %v835_v44 = vpop.f32.mrf.mxu0 }
 0x35d   : > { %v748_v46 = vpop.f32.mrf.mxu2 }
 0x365   : > { %v770_v49 = vpop.f32.mrf.mxu2 }
 0x366   : > { %v774_v50 = vmul.f32 0.35355338, %v770_v49 }
 0x368   : > { %v775_v51 = vsel %vm695_vm2, %v774_v50, -inf }
 0x369   : > { %776 = vmax.xlane.f32.xlu2 %v775_v51  ;;  %v1480_v51 = vld [vmem:[%s1898_s21] sm:$0xff] }
 0x36b   : > { %787 = vrot.lane.b32.xlu0 %v1932_v8, %s1713_s23  ;;  %s2139_s23 = scalar_lea.vmem %s2088_s8, %s1865_s18 }
 0x36d   : > { %v772_v53 = vpop.f32.mrf.mxu2 }
 0x371   : > { %908 = vadd.xlane.f32.xlu2 %v907_v54 }
 0x389   : > { %850 = vrot.lane.b32.xlu2 %v1932_v8, %s1714_s22 }
 0x3ca   : > { %v840_v55 = vpop.xlane.xlu0 %839 }
 0x3cb   : > { %v841_v56 = vsub.f32 %v837_v41, %v840_v55  ;;  %v1488_v55 = vld [vmem:[%s1912_s0 + $0x30] sm:$0xff] }
 0x3cd   : > { %v842_v57 = vmul.f32 1.442695, %v841_v56 }
 0x3cf   : > { %1591 = vpow2.f32 %v842_v57  ;;  %v1487_v57 = vld [vmem:[%s1912_s0 + $0x28] sm:$0xff] }
 0x3d5   : > { %v1592_v58 = vpop.eup %1591 }
 0x3d6   : > { %v844_v59 = vsel %vm695_vm2, %v1592_v58, 0.0 }
 0x3d7   : > { %845 = vadd.xlane.f32.xlu1 %v844_v59 }
 0x3dc   : > { %v777_v60 = vpop.xlane.xlu2 %776 }
 0x3dd   : > { %v778_v61 = vsub.f32 %v774_v50, %v777_v60  ;;  %v788_v62 = vpop.permute.xlu0 %787  ;;  %v1481_v50 = vld [vmem:[%s1898_s21 + $0x8] sm:$0xff] }
 0x3de   : > { %v793_v63 = vsel %vm733_vm3, %v788_v62, 0 }
 0x3df   : > { %v779_v0 = vmul.f32 1.442695, %v778_v61  ;;  %802 = vmatpush.bf16.msra.mxu2 %v793_v63  ;;  %v1485_v61 = vld [vmem:[%s1912_s0 + $0x18] sm:$0xff] }
 0x3e1   : > { %1593 = vpow2.f32 %v779_v0  ;;  %v1484_v0 = vld [vmem:[%s1912_s0 + $0x10] sm:$0xff] }
 0x3e4   : > { %v909_v1 = vpop.xlane.xlu2 %908 }
 0x3e7   : > { %v1594_v2 = vpop.eup %1593 }
 0x3e8   : > { %v781_v4 = vsel %vm695_vm2, %v1594_v2, 0.0 }
 0x3e9   : > { %782 = vadd.xlane.f32.xlu0 %v781_v4  ;;  %v1579_v4 = vld [vmem:[%s2137_s27] ss:$0 sm:$0xff] }
 0x3ec   : > { %v851_v5 = vpop.permute.xlu2 %850 }
 0x3ed   : > { %v856_v6 = vsel %vm733_vm3, %v851_v5, 0 }
 0x3ee   : > { %865 = vmatpush.bf16.msrb.mxu1 %v856_v6  ;;  %v1580_v6 = vld [vmem:[%s2138_s15] ss:$0 sm:$0xff] }
 0x3f2   : > { %1043 = vmatpush.bf16.msra.mxu1 %v1481_v50 }
 0x3f6   : > { %1044 = vmatpush.bf16.msra.mxu1 %v1480_v51 }
 0x3fd   : > { %913 = vrot.lane.b32.xlu0 %v1932_v8, %s1715_s12 }
 0x44a   : > { %v846_v7 = vpop.xlane.xlu1 %845 }
 0x44b   : > { %1595 = vrcp.f32 %v846_v7 }
 0x451   : > { %v1596_v9 = vpop.eup %1595 }
 0x452   : > { %v848_v10 = vmul.f32 %v1596_v9, %v1592_v58  ;;  %v1486_v58 = vld [vmem:[%s1912_s0 + $0x20] sm:$0xff] }
 0x454   : > { %v849_v11 = vpack.c.bf16 %v848_v10, %v848_v10 }
 0x456   : > { %1416 = vmatmul.msk.bf16.vlgmr.msrb.gmra.mxu1 %vm695_vm2, %v849_v11 }
 0x45c   : > { %v783_v12 = vpop.xlane.xlu0 %782 }
 0x45d   : > { %1597 = vrcp.f32 %v783_v12  ;;  %v1483_v12 = vld [vmem:[%s1912_s0 + $0x8] sm:$0xff] }
 0x45e   : > { %1599 = vrcp.f32 %v909_v1 }
 0x45f   : > { %1601 = vrcp.f32 %v1719_v39  ;;  %v1583_v39 = vld [vmem:[%s635_s1] ss:$0 sm:$0xff] }
 0x463   : > { %v1598_v13 = vpop.eup %1597 }
 0x464   : > { %v785_v14 = vmul.f32 %v1598_v13, %v1594_v2  ;;  %v1600_v16 = vpop.eup %1599  ;;  %v1482_v13 = vld [vmem:[%s1912_s0] sm:$0xff] }
 0x465   : > { %v911_v8 = vmul.f32 %v1600_v16, %v1590_v52  ;;  %v1602_v40 = vpop.eup %1601  ;;  %v1489_v52 = vld [vmem:[%s1912_s0 + $0x38] sm:$0xff] }
 0x466   : > { %v786_v15 = vpack.c.bf16 %v785_v14, %v785_v14  ;;  %v980_v41 = vmul.f32 32.0, %v1602_v40  ;;  %vm984_vm7 = vweird.f32 %v1602_v40  ;;  %1120 = vmatpush.bf16.msrb.mxu3 %v1489_v52  ;;  %v1581_v14 = vld [vmem:[%s2139_s23] ss:$0 sm:$0xff] }
 0x467   : > { %v912_v19 = vpack.c.bf16 %v911_v8, %v911_v8 }
 0x468   : > { %1414 = vmatmul.msk.bf16.vlgmr.msra.gmra.mxu2 %vm695_vm2, %v786_v15  ;;  %v981_v42 = vsub.f32 1.0, %v980_v41  ;;  %v1584_v41 = vld [vmem:[%s638_s7] ss:$0 sm:$0xff] }
 0x46a   : > { %v982_v43 = vmul.f32 %v1602_v40, %v981_v42  ;;  %1121 = vmatpush.bf16.msrb.mxu3 %v1488_v55 }
 0x46c   : > { %v983_v44 = vadd.f32 %v1602_v40, %v982_v43 }
 0x46e   : > { %v1981_v45 = vsel %vm984_vm7, %v1602_v40, %v983_v44  ;;  %1122 = vmatpush.bf16.msrb.mxu3 %v1487_v57 }
 0x46f   : > { %v914_v17 = vpop.permute.xlu0 %913 }
 0x470   : > { %v919_v18 = vsel %vm733_vm3, %v914_v17, 0 }
 0x471   : > { %928 = vmatpush.bf16.msrb.mxu2 %v919_v18 }
 0x472   : > { %1123 = vmatpush.bf16.msrb.mxu3 %v1486_v58 }
 0x476   : > { %1124 = vmatpush.bf16.msrb.mxu3 %v1485_v61 }
 0x478   : > { %1418 = vmatmul.msk.bf16.vlgmr.msrb.gmra.mxu2 %vm695_vm2, %v912_v19  ;;  %v1582_v19 = vld [vmem:[%s632_s19] ss:$0 sm:$0xff] }
 0x47a   : > { %1125 = vmatpush.bf16.msrb.mxu3 %v1484_v0 }
 0x47e   : > { %1126 = vmatpush.bf16.msrb.mxu3 %v1483_v12 }
 0x482   : > { %1127 = vmatpush.bf16.msrb.mxu3 %v1482_v13 }
 0x4d3   : > { %v867_v20 = vpop.f32.mrf.mxu1 }
 0x4d4   : > { %872 = vrot.lane.b32.xlu0 %v867_v20, %s1716_s30 }
 0x4db   : > { %v869_v21 = vpop.f32.mrf.mxu1 }
 0x4eb   : > { %v804_v22 = vpop.f32.mrf.mxu2 }
 0x4ec   : > { %809 = vrot.lane.b32.xlu1 %v804_v22, %s1717_s14 }
 0x4f3   : > { %v806_v23 = vpop.f32.mrf.mxu2 }
 0x4fb   : > { %v930_v24 = vpop.f32.mrf.mxu2 }
 0x4fc   : > { %935 = vrot.lane.b32.xlu0 %v930_v24, %s1718_s25 }
 0x503   : > { %v932_v25 = vpop.f32.mrf.mxu2 }
 0x546   : > { %v873_v29 = vpop.permute.xlu0 %872 }
 0x55e   : > { %v810_v28 = vpop.permute.xlu1 %809 }
 0x55f   : > { %813 = vst.msk [vmem:[#allocation3] sm:$0xff] %vm812_vm4, %v810_v28 }
 0x560   : > { %876 = vst.msk [vmem:[#allocation3] sm:$0xff] %vm875_vm5, %v873_v29 }
 0x56e   : > { %v936_v30 = vpop.permute.xlu0 %935 }
 0x56f   : > { %939 = vst.msk [vmem:[#allocation3] sm:$0xff] %vm938_vm6, %v936_v30 }
 0x576   : > { %v940_v31 = vld [vmem:[#allocation3] sm:$0xff] }
 0x577   : > { %v941_v32 = vpack.c.bf16 %v940_v31, %v940_v31 }
 0x579   : > { %1427 = vmatmul.msk.bf16.vlgmr.msra.gmra.mxu0 %vm669_vm1, %v941_v32 }
 0x5f6   : > { %v969_v34 = vpop.f32.mrf.mxu0 }
 0x5f7   : > { %v970_v35 = vadd.f32 %v1578_v33, %v969_v34 }
 0x5f9   : > { %v973_v36 = vadd.f32 %v970_v35, %v1927_v3 }
 0x5fb   : > { %v976_v37 = vsel %vm669_vm1, %v973_v36, 0.0 }
 0x5fc   : > { %977 = vadd.xlane.f32.xlu0 %v976_v37 }
 0x5fe   : > { %v971_v38 = vpop.f32.mrf.mxu0 }
 0x66f   : > { %v978_v46 = vpop.xlane.xlu0 %977 }
 0x670   : > { %v986_v3 = vmul.f32 %v1981_v45, %v978_v46 }
 0x672   : > { %v987_v47 = vsub.f32 %v973_v36, %v986_v3 }
 0x674   : > { %v988_v48 = vmul.f32 %v987_v47, %v987_v47 }
 0x676   : > { %v989_v49 = vsel %vm669_vm1, %v988_v48, 0.0 }
 0x677   : > { %990 = vadd.xlane.f32.xlu2 %v989_v49 }
 0x6ea   : > { %v991_v53 = vpop.xlane.xlu2 %990 }
 0x6eb   : > { %v992_v54 = vmul.f32 %v991_v53, %v1981_v45 }
 0x6ed   : > { %v993_v56 = vadd.f32 1e-05, %v992_v54 }
 0x6ef   : > { %1603 = vrsqrt.f32 %v993_v56  ;;  %vm1000_vm9 = vweird.f32 %v993_v56 }
 0x6f5   : > { %v1604_v59 = vpop.eup %1603 }
 0x6f6   : > { %v995_v60 = vmul.f32 %v1604_v59, %v993_v56  ;;  %vm1001_vm8 = vweird.f32 %v1604_v59 }
 0x6f7   : > { %vm1002_vm10 = vmor %vm1000_vm9, %vm1001_vm8 }
 0x6f8   : > { %v996_v62 = vmul.f32 %v1604_v59, %v995_v60 }
 0x6fa   : > { %v997_v63 = vmul.f32 0.5, %v996_v62 }
 0x6fc   : > { %v998_v1 = vsub.f32 1.5, %v997_v63 }
 0x6fe   : > { %v999_v2 = vmul.f32 %v1604_v59, %v998_v1 }
 0x700   : > { %v1003_v5 = vsel %vm1002_vm10, %v1604_v59, %v999_v2 }
 0x701   : > { %v1004_v7 = vmul.f32 %v1003_v5, %v987_v47 }
 0x703   : > { %v1008_v9 = vmul.f32 %v1579_v4, %v1004_v7 }
 0x705   : > { %v1012_v10 = vadd.f32 %v1580_v6, %v1008_v9 }
 0x707   : > { %v1017_v11 = vpack.c.bf16 %v1012_v10, %v1012_v10 }
 0x709   : > { %1436 = vmatmul.msk.bf16.vlgmr.msra.gmra.mxu1 %vm669_vm1, %v1017_v11 }
 0x786   : > { %v1046_v15 = vpop.f32.mrf.mxu1 }
 0x787   : > { %v1047_v16 = vadd.f32 %v1581_v14, %v1046_v15 }
 0x789   : > { %v1050_v17 = vmax.f32 %v1047_v16, 0.0 }
 0x78b   : > { %v1067_v18 = vpack.c.bf16 %v1050_v17, %v1050_v17 }
 0x78d   : > { %1128 = vmatmul.bf16.vlgmr.msrb.gmra.mxu3 %v1067_v18 }
 0x78e   : > { %v1048_v8 = vpop.f32.mrf.mxu1 }
 0x810   : > { %v1129_v20 = vpop.f32.mrf.mxu3 }
 0x811   : > { %v1130_v21 = vadd.f32 %v1582_v19, %v1129_v20 }
 0x813   : > { %v1133_v22 = vadd.f32 %v1130_v21, %v1012_v10 }
 0x815   : > { %v1136_v23 = vsel %vm669_vm1, %v1133_v22, 0.0 }
 0x816   : > { %1137 = vadd.xlane.f32.xlu1 %v1136_v23 }
 0x818   : > { %v1131_v24 = vpop.f32.mrf.mxu3 }
 0x889   : > { %v1138_v25 = vpop.xlane.xlu1 %1137 }
 0x88a   : > { %v1139_v26 = vmul.f32 %v1138_v25, %v1981_v45 }
 0x88c   : > { %v1140_v27 = vsub.f32 %v1133_v22, %v1139_v26 }
 0x88e   : > { %v1141_v28 = vmul.f32 %v1140_v27, %v1140_v27 }
 0x890   : > { %v1142_v29 = vsel %vm669_vm1, %v1141_v28, 0.0 }
 0x891   : > { %1143 = vadd.xlane.f32.xlu0 %v1142_v29 }
 0x904   : > { %v1144_v30 = vpop.xlane.xlu0 %1143 }
 0x905   : > { %v1145_v31 = vmul.f32 %v1144_v30, %v1981_v45 }
 0x907   : > { %v1146_v32 = vadd.f32 1e-05, %v1145_v31 }
 0x909   : > { %1605 = vrsqrt.f32 %v1146_v32  ;;  %vm1153_vm12 = vweird.f32 %v1146_v32 }
 0x90f   : > { %v1606_v33 = vpop.eup %1605 }
 0x910   : > { %v1148_v34 = vmul.f32 %v1606_v33, %v1146_v32  ;;  %vm1154_vm11 = vweird.f32 %v1606_v33 }
 0x911   : > { %vm1155_vm13 = vmor %vm1153_vm12, %vm1154_vm11 }
 0x912   : > { %v1149_v35 = vmul.f32 %v1606_v33, %v1148_v34 }
 0x914   : > { %v1150_v36 = vmul.f32 0.5, %v1149_v35 }
 0x916   : > { %v1151_v37 = vsub.f32 1.5, %v1150_v36 }
 0x918   : > { %v1152_v38 = vmul.f32 %v1606_v33, %v1151_v37 }
 0x91a   : > { %v1156_v40 = vsel %vm1155_vm13, %v1606_v33, %v1152_v38 }
 0x91b   : > { %v1157_v42 = vmul.f32 %v1156_v40, %v1140_v27 }
 0x91d   : > { %v1161_v43 = vmul.f32 %v1583_v39, %v1157_v42  ;;  %1170 = sbr.rel (%p1469_p1) target bundleno = 2358 (0x936), region = 80 }
 0x91f   : > { %v1165_v44 = vadd.f32 %v1584_v41, %v1161_v43 }
 0x921   : > { %1166 = vst.msk [vmem:[#allocation2] sm:$0xff] %vm669_vm1, %v1165_v44 }
 0x922   : > { %v1171_v45 = vsel %vm669_vm1, %v1165_v44, 0.0  ;;  %v1720_v3 = vmov 8.0   ;;  %vm1186_vm15 = vcmask 253952  }
 0x923   : > { %v1172_v46 = vrot.slane %v1171_v45, 4  ;;  %1607 = vrcp.f32 %v1720_v3 }
 0x925   : > { %v1173_v47 = vadd.f32 %v1172_v46, %v1171_v45 }
 0x927   : > { %v1174_v48 = vrot.slane %v1173_v47, 2 }
 0x929   : > { %v1608_v49 = vpop.eup %1607  ;;  %v1175_v50 = vadd.f32 %v1174_v48, %v1173_v47 }
 0x92a   : > { %v1179_v51 = vmul.f32 8.0, %v1608_v49  ;;  %vm1183_vm14 = vweird.f32 %v1608_v49 }
 0x92b   : > { %v1176_v52 = vrot.slane %v1175_v50, 1 }
 0x92c   : > { %v1180_v53 = vsub.f32 1.0, %v1179_v51 }
 0x92d   : > { %v1177_v55 = vadd.f32 %v1176_v52, %v1175_v50 }
 0x92e   : > { %v1181_v54 = vmul.f32 %v1608_v49, %v1180_v53 }
 0x930   : > { %v1182_v56 = vadd.f32 %v1608_v49, %v1181_v54 }
 0x932   : > { %v1184_v57 = vsel %vm1183_vm14, %v1608_v49, %v1182_v56 }
 0x933   : > { %v1185_v58 = vmul.f32 %v1184_v57, %v1177_v55 }
 0x935   : > { %1187 = vst.msk [vmem:[%s1924_s20] sm:$0x1] %vm1186_vm15, %v1185_v58 }
 0x936 PF: > { %s2142_s7 = sld [smem:[#allocation10_spill]]  ;;  %s1199_s21 = sshll.u32 %s1924_s20, 4  ;;  %s1200_s21 = int_to_ptr.vmem [resolvable:$true] %s1199_s21 }
 0x937   : > { %s2143_s2 = sld [smem:[#allocation25_spill]]  ;;  %s2145_s16 = sand.u32 1, %s1679_s26  }
 0x938   : > { %s1189_s24 = scalar_lea.sflag [#allocation5], %s2145_s16 }
 0x93d   : > { %s1197_s29 = scalar_lea.hbm %s2143_s2, %s2142_s7  ;;  %s1629_s22 = scalar_lea.hbm %s2143_s2, 2 }
 0x93e   : > { %s1201_s27 = sshll.u32 %s1197_s29, 4  ;;  %s1202_s27 = int_to_ptr.hbm [resolvable:$true] %s1201_s27 }
 0x93f   : > { %s1623_s15 = sshra.s32 %s1202_s27, 4  ;;  %s1624_s15 = int_to_ptr.hbm [resolvable:$true] %s1623_s15 }
 0x940   : > { %s1625_s28 = scalar_lea.hbm %s1624_s15, 1  ;;  %p1630_p6 = scmp.lt.s32.totalorder %s1624_s15, %s2143_s2 }
 0x941   : > { %p1626_p2 = scmp.ne.s32.totalorder %s1624_s15, %s1625_s28  ;;  %p1631_p7 = scmp.lt.s32.totalorder %s1629_s22, %s1625_s28 }
 0x943   : > { %p1627_p4 = pnand %p1626_p2, %p1840_p3  ;;  %p1632_p8 = por %p1631_p7, %p1630_p6 }
 0x945   : > { %p1628_p5 = pneg %p1627_p4 }
 0x947   : > { %p1633_p10 = pnand %p1632_p8, %p1628_p5 }
 0x949   : > { %1636 = shalt.err (!%p1633_p10)
}
 0x94a   : > { %1490 = dma.vmem_to_hbm [thread:$0]  (%p1840_p3), %s1200_s21, 16, %s1202_s27, %s1189_s24  }
 0x94b PF: > { %s2146_s20 = sld [smem:[#allocation13_spill]] }
 0x94c   : > { %s2147_s19 = sld [smem:[#allocation7_spill]] }
 0x951   : > { %p1496_p11 = scmp.ge.s32.totalorder %s2146_s20, 2 }
 0x952   : > { %s1213_s14 = sand.u32 1, %s2147_s19  }
 0x953   : > { %p1493_p12 = pnand %p1496_p11, %p1850_p9  ;;  %s1214_s25 = scalar_lea.sflag [#allocation5], %s1213_s14 }
 0x955   : > { %p1494_p13 = pneg %p1493_p12 }
 0x957   : > { %1670 = dma.done.wait (%p1494_p13), %s1214_s25, 16  }
 0x958   : > { %1672 = vsyncadd (%p1494_p13), %s1214_s25, 4294967280  ;;  %s26_s15 = sadd.s32 1, %s2146_s20   ;;  %s2149_s13 = sld [smem:[#allocation8_spill]] }
 0x959   : > { %p23_p0 = scmp.ge.s32.totalorder %s26_s15, 6   ;;  %s2150_s27 = sld [smem:[#allocation18_spill]] }
 0x95a   : > { %s2151_s28 = sld [smem:[#allocation11_spill]]  ;;  %s2155_s25 = smov %s1679_s26 }
 0x95b   : > { %s2152_s29 = sld [smem:[#allocation12_spill]]  ;;  %25 = sbr.rel (!%p23_p0) target bundleno = 13 (0xd), region = 151 }
 0x95c   : > { %s2153_s30 = sld [smem:[#allocation14_spill]] }
 0x95d   : > { %s2154_s14 = sld [smem:[#allocation16_spill]] }
 0x95e   : > { %s2156_s26 = smov %s2149_s13 }
 0x960   :  { %1219 = vsyncpa [#allocation5], 1 }
 0x961   :  { %1221 = vsyncpa [#allocation5 + $0x1], 1 }

</bundles_post_ra>
